<compile_context>
chip_gen: v7x
topology: tpu7x:2x2x1
jax: 0.10.0
libtpu: 0.0.40
codegen_flags: <defaults>
</compile_context>

<pallas_src>
import functools

import jax
import jax.numpy as jnp
import numpy as np
from jax import lax
from jax.experimental import pallas as pl
from jax.experimental.pallas import tpu as pltpu


def _im2col_conv3x3(src_hwc, w_ref, pad_ref, col_ref, Hp, Wp, C):
    """3x3 'same' conv of one (Hp, Wp, C) image as a single im2col matmul.

    pad_ref: (Hp+2, Wp+2, C) per-image padded tile (VMEM scratch, tiny).
    col_ref: (Hp*Wp, 9*C)    im2col matrix (VMEM scratch).
    w_ref:   (9*C, Cout)     flattened HWIO weights.
    Returns (Hp*Wp, Cout) f32.
    """
    # Zero-fill + interior write of a small per-image tile (the old version
    # zero-filled two full-batch buffers per call).
    pad_ref[...] = jnp.zeros_like(pad_ref)
    pad_ref[1:Hp + 1, 1:Wp + 1, :] = src_hwc
    padded = pad_ref[...]

    # Gather the 9 shifted windows into one (Hp*Wp, 9*C) matrix so the conv
    # is a single MXU matmul with K = 9*C (instead of nine K=C dots).
    k = 0
    for dy in range(3):
        for dx in range(3):
            col_ref[:, k * C:(k + 1) * C] = (
                padded[dy:dy + Hp, dx:dx + Wp, :].reshape(Hp * Wp, C))
            k += 1

    return jnp.dot(col_ref[...], w_ref[...], preferred_element_type=jnp.float32)


def _pass1_kernel(x_ref, w1_ref, h1_ref, st1_ref, pad_ref, col_ref,
                  *, Hp, Wp, Cin, Cmid):
    """MaxPool2d(2) + conv1 for one image; emits per-image BN1 partial stats."""
    # 2x2 max-pool: elementwise max of four statically indexed views (VPU only).
    pooled = jnp.maximum(jnp.maximum(x_ref[0, 0], x_ref[0, 1]),
                         jnp.maximum(x_ref[1, 0], x_ref[1, 1])).astype(jnp.float32)

    h1 = _im2col_conv3x3(pooled, w1_ref, pad_ref, col_ref, Hp, Wp, Cin)  # (Hp*Wp, Cmid)
    h1_ref[...] = h1.reshape(Hp, Wp, Cmid)

    # Fused BN statistics: per-image sum and sum of squares (combined globally
    # in pass 2), instead of a second pass computing (x - mean)^2.
    st1_ref[0:1, :] = jnp.sum(h1, axis=0, keepdims=True)
    st1_ref[1:2, :] = jnp.sum(h1 * h1, axis=0, keepdims=True)


def _pass2_kernel(h1_ref, st1_ref, g1_ref, b1_ref, w2_ref, h2_ref, st2_ref,
                  pad_ref, col_ref, *, Hp, Wp, Cmid, Cout, inv_n, eps):
    """Global BN1 + ReLU + conv2 for one image; emits per-image BN2 partial stats."""
    # Combine the per-image partial sums into global batch statistics (tiny).
    tot = jnp.sum(st1_ref[...], axis=0)                      # (2, Cmid)
    mean = tot[0:1, :] * inv_n                               # (1, Cmid)
    var = jnp.maximum(tot[1:2, :] * inv_n - mean * mean, 0.0)
    rstd = lax.rsqrt(var + eps)
    scale = (rstd * g1_ref[...]).reshape(1, 1, Cmid)
    shift = (b1_ref[...] - mean * rstd * g1_ref[...]).reshape(1, 1, Cmid)

    y1 = jnp.maximum(h1_ref[...] * scale + shift, 0.0)       # BN1 + ReLU

    h2 = _im2col_conv3x3(y1, w2_ref, pad_ref, col_ref, Hp, Wp, Cmid)  # (Hp*Wp, Cout)
    h2_ref[...] = h2.reshape(Hp, Wp, Cout)

    st2_ref[0:1, :] = jnp.sum(h2, axis=0, keepdims=True)
    st2_ref[1:2, :] = jnp.sum(h2 * h2, axis=0, keepdims=True)


def _pass3_kernel(h2_ref, st2_ref, g2_ref, b2_ref, out_ref, *, Cout, inv_n, eps):
    """Global BN2 + ReLU for one image."""
    tot = jnp.sum(st2_ref[...], axis=0)                      # (2, Cout)
    mean = tot[0:1, :] * inv_n
    var = jnp.maximum(tot[1:2, :] * inv_n - mean * mean, 0.0)
    rstd = lax.rsqrt(var + eps)
    scale = (rstd * g2_ref[...]).reshape(1, 1, Cout)
    shift = (b2_ref[...] - mean * rstd * g2_ref[...]).reshape(1, 1, Cout)

    out_ref[...] = jnp.maximum(h2_ref[...] * scale + shift, 0.0).astype(out_ref.dtype)
    # TODO(synk): PyTorch training-mode BN also updates running_mean/running_var
    # in-place; that side effect does not affect the returned tensor and is not
    # reproduced here.


def down_forward(x_nchw, w1, g1, b1, w2, g2, b2, eps=1e-5):
    """Pallas implementation of Down.forward.  x_nchw: (B,Cin,H,W) -> (B,Cout,H/2,W/2)."""
    B, Cin, H, W = x_nchw.shape
    Hp, Wp = H // 2, W // 2
    Cmid = w1.shape[3]
    Cout = w2.shape[3]
    n_pix = Hp * Wp
    inv_n = 1.0 / float(B * n_pix)   # BN stats are over (B, H/2, W/2), biased variance

    # Layout-only glue: NCHW -> (B, 2, 2, Hp, Wp, Cin).  The 2x2 pool offsets
    # become cheap leading axes; channels stay on the lane dim.
    x = jnp.transpose(x_nchw, (0, 2, 3, 1)).reshape(B, Hp, 2, Wp, 2, Cin)
    x = jnp.transpose(x, (0, 2, 4, 1, 3, 5))
    # HWIO weights flattened to (9*C_in, C_out); row order (dy, dx, ci) matches
    # the in-kernel im2col column order.
    w1f = w1.reshape(9 * Cin, Cmid)
    w2f = w2.reshape(9 * Cmid, Cout)

    cparams = pltpu.CompilerParams(
        dimension_semantics=("parallel",),           # batch tiles are independent
        vmem_limit_bytes=32 * 1024 * 1024,           # safe on v5e/v6e/v7x
    )

    def per_b(*shape):
        # One image per grid step; batch dim squeezed out of the kernel ref.
        return pl.BlockSpec((None,) + shape, lambda b: (b,) + (0,) * len(shape))

    def full(*shape):
        # Small arrays (weights / BN params / partial stats): whole array each step.
        return pl.BlockSpec(shape, lambda b: (0,) * len(shape))

    # -------- pass 1: maxpool + conv1 + per-image BN1 partial stats --------
    h1, st1 = pl.pallas_call(
        functools.partial(_pass1_kernel, Hp=Hp, Wp=Wp, Cin=Cin, Cmid=Cmid),
        grid=(B,),
        in_specs=[per_b(2, 2, Hp, Wp, Cin), full(9 * Cin, Cmid)],
        out_specs=(per_b(Hp, Wp, Cmid), per_b(2, Cmid)),
        out_shape=(jax.ShapeDtypeStruct((B, Hp, Wp, Cmid), jnp.float32),
                   jax.ShapeDtypeStruct((B, 2, Cmid), jnp.float32)),
        scratch_shapes=[pltpu.VMEM((Hp + 2, Wp + 2, Cin), jnp.float32),
                        pltpu.VMEM((n_pix, 9 * Cin), jnp.float32)],
        compiler_params=cparams,
    )(x, w1f)

    # -------- pass 2: global BN1 + ReLU + conv2 + per-image BN2 partial stats ----
    h2, st2 = pl.pallas_call(
        functools.partial(_pass2_kernel, Hp=Hp, Wp=Wp, Cmid=Cmid, Cout=Cout,
                          inv_n=inv_n, eps=eps),
        grid=(B,),
        in_specs=[per_b(Hp, Wp, Cmid), full(B, 2, Cmid), full(1, Cmid),
                  full(1, Cmid), full(9 * Cmid, Cout)],
        out_specs=(per_b(Hp, Wp, Cout), per_b(2, Cout)),
        out_shape=(jax.ShapeDtypeStruct((B, Hp, Wp, Cout), jnp.float32),
                   jax.ShapeDtypeStruct((B, 2, Cout), jnp.float32)),
        scratch_shapes=[pltpu.VMEM((Hp + 2, Wp + 2, Cmid), jnp.float32),
                        pltpu.VMEM((n_pix, 9 * Cmid), jnp.float32)],
        compiler_params=cparams,
    )(h1, st1, g1, b1, w2f)

    # -------- pass 3: global BN2 + ReLU --------
    out_nhwc = pl.pallas_call(
        functools.partial(_pass3_kernel, Cout=Cout, inv_n=inv_n, eps=eps),
        grid=(B,),
        in_specs=[per_b(Hp, Wp, Cout), full(B, 2, Cout), full(1, Cout), full(1, Cout)],
        out_specs=per_b(Hp, Wp, Cout),
        out_shape=jax.ShapeDtypeStruct((B, Hp, Wp, Cout), x_nchw.dtype),
        compiler_params=cparams,
    )(h2, st2, g2, b2)

    # Layout-only glue: NHWC -> NCHW to match the PyTorch output convention.
    return jnp.transpose(out_nhwc, (0, 3, 1, 2))


def down_ref(x, w1, g1, b1, w2, g2, b2, eps=1e-5):
    """Pure-JAX reference for correctness checking (NCHW in/out)."""
    B, C, H, W = x.shape
    p = x.reshape(B, C, H // 2, 2, W // 2, 2).max(axis=(3, 5))

    def conv_bn_relu(h, w, g, b):
        y = lax.conv_general_dilated(h, w, (1, 1), 'SAME',
                                     dimension_numbers=('NCHW', 'HWIO', 'NCHW'))
        mean = y.mean(axis=(0, 2, 3), keepdims=True)
        var = ((y - mean) ** 2).mean(axis=(0, 2, 3), keepdims=True)
        y = (y - mean) * lax.rsqrt(var + eps) * g.reshape(1, -1, 1, 1) + b.reshape(1, -1, 1, 1)
        return jnp.maximum(y, 0.0)

    return conv_bn_relu(conv_bn_relu(p, w1, g1, b1), w2, g2, b2)


if __name__ == "__main__":
    # Small shapes consistent with Down(in_channels=4, out_channels=8).
    B, Cin, H, W = 2, 4, 16, 16
    Cout = 8
    Cmid = Cout  # DoubleConv default: mid_channels = out_channels

    key = jax.random.PRNGKey(0)
    kx, kw1, kw2 = jax.random.split(key, 3)

    x = jax.random.normal(kx, (B, Cin, H, W), jnp.float32)
    # Conv weights (HWIO); deterministic synthetic init.
    w1 = jax.random.normal(kw1, (3, 3, Cin, Cmid), jnp.float32) * 0.2
    w2 = jax.random.normal(kw2, (3, 3, Cmid, Cout), jnp.float32) * 0.2
    # BatchNorm affine params, PyTorch default init: weight=1, bias=0.
    g1 = jnp.ones((1, Cmid), jnp.float32)
    b1 = jnp.zeros((1, Cmid), jnp.float32)
    g2 = jnp.ones((1, Cout), jnp.float32)
    b2 = jnp.zeros((1, Cout), jnp.float32)

    out = down_forward(x, w1, g1, b1, w2, g2, b2)
    jax.block_until_ready(out)

    assert out.shape == (B, Cout, H // 2, W // 2), out.shape

    ref = down_ref(x, w1, g1, b1, w2, g2, b2)
    np.testing.assert_allclose(np.asarray(out), np.asarray(ref), rtol=2e-3, atol=2e-3)

    print("KERNEL_OK")
</pallas_src>

<mosaic_0001>
module attributes {stable_mosaic.version = 11 : i64} {
  func.func @_pass1_kernel(%arg0: i32, %arg1: memref<1x2x2x8x8x4xf32, #tpu.memory_space<vmem>>, %arg2: memref<36x8xf32, #tpu.memory_space<vmem>>, %arg3: memref<1x8x8x8xf32, #tpu.memory_space<vmem>>, %arg4: memref<1x2x8xf32, #tpu.memory_space<vmem>>, %arg5: memref<10x10x4xf32, #tpu.memory_space<vmem>>, %arg6: memref<64x36xf32, #tpu.memory_space<vmem>>) attributes {dimension_semantics = [#tpu.dimension_semantics<parallel>], iteration_bounds = array<i64: 2>, scalar_prefetch = 0 : i64, scratch_operands = 2 : i64, tpu.core_type = #tpu.core_type<tc>, window_params = [{transform_indices = @transform_0, window_bounds = array<i64: 1, 2, 2, 8, 8, 4>}, {pipeline_mode = #tpu.pipeline_mode<synchronous>, transform_indices = @transform_1, window_bounds = array<i64: 36, 8>}, {transform_indices = @transform_2, window_bounds = array<i64: 1, 8, 8, 8>}, {transform_indices = @transform_3, window_bounds = array<i64: 1, 2, 8>}]} {
    %c0 = arith.constant 0 : index
    %c0_0 = arith.constant 0 : index
    %c0_1 = arith.constant 0 : index
    %c0_2 = arith.constant 0 : index
    %c0_3 = arith.constant 0 : index
    %c0_4 = arith.constant 0 : index
    %0 = vector.load %arg1[%c0, %c0_0, %c0_1, %c0_2, %c0_3, %c0_4] : memref<1x2x2x8x8x4xf32, #tpu.memory_space<vmem>>, vector<1x1x1x8x8x4xf32>
    %1 = vector.shape_cast %0 : vector<1x1x1x8x8x4xf32> to vector<8x8x4xf32>
    %c0_5 = arith.constant 0 : index
    %c0_6 = arith.constant 0 : index
    %c1 = arith.constant 1 : index
    %c0_7 = arith.constant 0 : index
    %c0_8 = arith.constant 0 : index
    %c0_9 = arith.constant 0 : index
    %2 = vector.load %arg1[%c0_5, %c0_6, %c1, %c0_7, %c0_8, %c0_9] : memref<1x2x2x8x8x4xf32, #tpu.memory_space<vmem>>, vector<1x1x1x8x8x4xf32>
    %3 = vector.shape_cast %2 : vector<1x1x1x8x8x4xf32> to vector<8x8x4xf32>
    %4 = arith.maximumf %1, %3 : vector<8x8x4xf32>
    %c0_10 = arith.constant 0 : index
    %c1_11 = arith.constant 1 : index
    %c0_12 = arith.constant 0 : index
    %c0_13 = arith.constant 0 : index
    %c0_14 = arith.constant 0 : index
    %c0_15 = arith.constant 0 : index
    %5 = vector.load %arg1[%c0_10, %c1_11, %c0_12, %c0_13, %c0_14, %c0_15] : memref<1x2x2x8x8x4xf32, #tpu.memory_space<vmem>>, vector<1x1x1x8x8x4xf32>
    %6 = vector.shape_cast %5 : vector<1x1x1x8x8x4xf32> to vector<8x8x4xf32>
    %c0_16 = arith.constant 0 : index
    %c1_17 = arith.constant 1 : index
    %c1_18 = arith.constant 1 : index
    %c0_19 = arith.constant 0 : index
    %c0_20 = arith.constant 0 : index
    %c0_21 = arith.constant 0 : index
    %7 = vector.load %arg1[%c0_16, %c1_17, %c1_18, %c0_19, %c0_20, %c0_21] : memref<1x2x2x8x8x4xf32, #tpu.memory_space<vmem>>, vector<1x1x1x8x8x4xf32>
    %8 = vector.shape_cast %7 : vector<1x1x1x8x8x4xf32> to vector<8x8x4xf32>
    %9 = arith.maximumf %6, %8 : vector<8x8x4xf32>
    %10 = arith.maximumf %4, %9 : vector<8x8x4xf32>
    %cst = arith.constant 0.000000e+00 : f32
    %11 = vector.broadcast %cst : f32 to vector<10x10x4xf32>
    %c0_22 = arith.constant 0 : index
    %c0_23 = arith.constant 0 : index
    %c0_24 = arith.constant 0 : index
    %12 = vector.load %arg5[%c0_22, %c0_23, %c0_24] : memref<10x10x4xf32, #tpu.memory_space<vmem>>, vector<10x10x4xf32>
    tpu.vector_store %arg5[%c0_22, %c0_23, %c0_24], %11 {strides = array<i32>} : memref<10x10x4xf32, #tpu.memory_space<vmem>>, vector<10x10x4xf32>,
    %c1_25 = arith.constant 1 : index
    %c1_26 = arith.constant 1 : index
    %c0_27 = arith.constant 0 : index
    %13 = vector.load %arg5[%c1_25, %c1_26, %c0_27] : memref<10x10x4xf32, #tpu.memory_space<vmem>>, vector<8x8x4xf32>
    tpu.vector_store %arg5[%c1_25, %c1_26, %c0_27], %10 {strides = array<i32>} : memref<10x10x4xf32, #tpu.memory_space<vmem>>, vector<8x8x4xf32>,
    %c0_28 = arith.constant 0 : index
    %c0_29 = arith.constant 0 : index
    %c0_30 = arith.constant 0 : index
    %14 = vector.load %arg5[%c0_28, %c0_29, %c0_30] : memref<10x10x4xf32, #tpu.memory_space<vmem>>, vector<10x10x4xf32>
    %15 = vector.extract_strided_slice %14 {offsets = [0, 0, 0], sizes = [8, 8, 4], strides = [1, 1, 1]} : vector<10x10x4xf32> to vector<8x8x4xf32>
    %16 = vector.shape_cast %15 : vector<8x8x4xf32> to vector<64x4xf32>
    %c0_31 = arith.constant 0 : index
    %c0_32 = arith.constant 0 : index
    %17 = vector.load %arg6[%c0_31, %c0_32] : memref<64x36xf32, #tpu.memory_space<vmem>>, vector<64x4xf32>
    tpu.vector_store %arg6[%c0_31, %c0_32], %16 {strides = array<i32>} : memref<64x36xf32, #tpu.memory_space<vmem>>, vector<64x4xf32>,
    %18 = vector.extract_strided_slice %14 {offsets = [0, 1, 0], sizes = [8, 8, 4], strides = [1, 1, 1]} : vector<10x10x4xf32> to vector<8x8x4xf32>
    %19 = vector.shape_cast %18 : vector<8x8x4xf32> to vector<64x4xf32>
    %c0_33 = arith.constant 0 : index
    %c4 = arith.constant 4 : index
    %20 = vector.load %arg6[%c0_33, %c4] : memref<64x36xf32, #tpu.memory_space<vmem>>, vector<64x4xf32>
    tpu.vector_store %arg6[%c0_33, %c4], %19 {strides = array<i32>} : memref<64x36xf32, #tpu.memory_space<vmem>>, vector<64x4xf32>,
    %21 = vector.extract_strided_slice %14 {offsets = [0, 2, 0], sizes = [8, 8, 4], strides = [1, 1, 1]} : vector<10x10x4xf32> to vector<8x8x4xf32>
    %22 = vector.shape_cast %21 : vector<8x8x4xf32> to vector<64x4xf32>
    %c0_34 = arith.constant 0 : index
    %c8 = arith.constant 8 : index
    %23 = vector.load %arg6[%c0_34, %c8] : memref<64x36xf32, #tpu.memory_space<vmem>>, vector<64x4xf32>
    tpu.vector_store %arg6[%c0_34, %c8], %22 {strides = array<i32>} : memref<64x36xf32, #tpu.memory_space<vmem>>, vector<64x4xf32>,
    %24 = vector.extract_strided_slice %14 {offsets = [1, 0, 0], sizes = [8, 8, 4], strides = [1, 1, 1]} : vector<10x10x4xf32> to vector<8x8x4xf32>
    %25 = vector.shape_cast %24 : vector<8x8x4xf32> to vector<64x4xf32>
    %c0_35 = arith.constant 0 : index
    %c12 = arith.constant 12 : index
    %26 = vector.load %arg6[%c0_35, %c12] : memref<64x36xf32, #tpu.memory_space<vmem>>, vector<64x4xf32>
    tpu.vector_store %arg6[%c0_35, %c12], %25 {strides = array<i32>} : memref<64x36xf32, #tpu.memory_space<vmem>>, vector<64x4xf32>,
    %27 = vector.extract_strided_slice %14 {offsets = [1, 1, 0], sizes = [8, 8, 4], strides = [1, 1, 1]} : vector<10x10x4xf32> to vector<8x8x4xf32>
    %28 = vector.shape_cast %27 : vector<8x8x4xf32> to vector<64x4xf32>
    %c0_36 = arith.constant 0 : index
    %c16 = arith.constant 16 : index
    %29 = vector.load %arg6[%c0_36, %c16] : memref<64x36xf32, #tpu.memory_space<vmem>>, vector<64x4xf32>
    tpu.vector_store %arg6[%c0_36, %c16], %28 {strides = array<i32>} : memref<64x36xf32, #tpu.memory_space<vmem>>, vector<64x4xf32>,
    %30 = vector.extract_strided_slice %14 {offsets = [1, 2, 0], sizes = [8, 8, 4], strides = [1, 1, 1]} : vector<10x10x4xf32> to vector<8x8x4xf32>
    %31 = vector.shape_cast %30 : vector<8x8x4xf32> to vector<64x4xf32>
    %c0_37 = arith.constant 0 : index
    %c20 = arith.constant 20 : index
    %32 = vector.load %arg6[%c0_37, %c20] : memref<64x36xf32, #tpu.memory_space<vmem>>, vector<64x4xf32>
    tpu.vector_store %arg6[%c0_37, %c20], %31 {strides = array<i32>} : memref<64x36xf32, #tpu.memory_space<vmem>>, vector<64x4xf32>,
    %33 = vector.extract_strided_slice %14 {offsets = [2, 0, 0], sizes = [8, 8, 4], strides = [1, 1, 1]} : vector<10x10x4xf32> to vector<8x8x4xf32>
    %34 = vector.shape_cast %33 : vector<8x8x4xf32> to vector<64x4xf32>
    %c0_38 = arith.constant 0 : index
    %c24 = arith.constant 24 : index
    %35 = vector.load %arg6[%c0_38, %c24] : memref<64x36xf32, #tpu.memory_space<vmem>>, vector<64x4xf32>
    tpu.vector_store %arg6[%c0_38, %c24], %34 {strides = array<i32>} : memref<64x36xf32, #tpu.memory_space<vmem>>, vector<64x4xf32>,
    %36 = vector.extract_strided_slice %14 {offsets = [2, 1, 0], sizes = [8, 8, 4], strides = [1, 1, 1]} : vector<10x10x4xf32> to vector<8x8x4xf32>
    %37 = vector.shape_cast %36 : vector<8x8x4xf32> to vector<64x4xf32>
    %c0_39 = arith.constant 0 : index
    %c28 = arith.constant 28 : index
    %38 = vector.load %arg6[%c0_39, %c28] : memref<64x36xf32, #tpu.memory_space<vmem>>, vector<64x4xf32>
    tpu.vector_store %arg6[%c0_39, %c28], %37 {strides = array<i32>} : memref<64x36xf32, #tpu.memory_space<vmem>>, vector<64x4xf32>,
    %39 = vector.extract_strided_slice %14 {offsets = [2, 2, 0], sizes = [8, 8, 4], strides = [1, 1, 1]} : vector<10x10x4xf32> to vector<8x8x4xf32>
    %40 = vector.shape_cast %39 : vector<8x8x4xf32> to vector<64x4xf32>
    %c0_40 = arith.constant 0 : index
    %c32 = arith.constant 32 : index
    %41 = vector.load %arg6[%c0_40, %c32] : memref<64x36xf32, #tpu.memory_space<vmem>>, vector<64x4xf32>
    tpu.vector_store %arg6[%c0_40, %c32], %40 {strides = array<i32>} : memref<64x36xf32, #tpu.memory_space<vmem>>, vector<64x4xf32>,
    %c0_41 = arith.constant 0 : index
    %c0_42 = arith.constant 0 : index
    %42 = vector.load %arg6[%c0_41, %c0_42] : memref<64x36xf32, #tpu.memory_space<vmem>>, vector<64x36xf32>
    %c0_43 = arith.constant 0 : index
    %c0_44 = arith.constant 0 : index
    %43 = vector.load %arg2[%c0_43, %c0_44] : memref<36x8xf32, #tpu.memory_space<vmem>>, vector<36x8xf32>
    %cst_45 = arith.constant dense<0.000000e+00> : vector<64x8xf32>
    %44 = tpu.matmul %42, %43, %cst_45 {dimension_numbers = #tpu.dot_dimension_numbers<[1], [0], [0], [1], [0, 0, 1, 1], [], []>} : vector<64x36xf32>, vector<36x8xf32>, vector<64x8xf32> -> vector<64x8xf32>
    %45 = vector.shape_cast %44 : vector<64x8xf32> to vector<8x8x8xf32>
    %c0_46 = arith.constant 0 : index
    %c0_47 = arith.constant 0 : index
    %c0_48 = arith.constant 0 : index
    %c0_49 = arith.constant 0 : index
    %46 = vector.load %arg3[%c0_46, %c0_47, %c0_48, %c0_49] : memref<1x8x8x8xf32, #tpu.memory_space<vmem>>, vector<1x8x8x8xf32>
    %47 = vector.shape_cast %46 : vector<1x8x8x8xf32> to vector<8x8x8xf32>
    %48 = vector.shape_cast %45 : vector<8x8x8xf32> to vector<1x8x8x8xf32>
    tpu.vector_store %arg3[%c0_46, %c0_47, %c0_48, %c0_49], %48 {strides = array<i32>} : memref<1x8x8x8xf32, #tpu.memory_space<vmem>>, vector<1x8x8x8xf32>,
    %cst_50 = arith.constant dense<0.000000e+00> : vector<8xf32>
    %49 = vector.multi_reduction <add>, %44, %cst_50 [0] : vector<64x8xf32> to vector<8xf32>
    %50 = vector.shape_cast %49 : vector<8xf32> to vector<1x8xf32>
    %c0_51 = arith.constant 0 : index
    %c0_52 = arith.constant 0 : index
    %c0_53 = arith.constant 0 : index
    %51 = vector.load %arg4[%c0_51, %c0_52, %c0_53] : memref<1x2x8xf32, #tpu.memory_space<vmem>>, vector<1x1x8xf32>
    %52 = vector.shape_cast %51 : vector<1x1x8xf32> to vector<1x8xf32>
    %53 = vector.shape_cast %50 : vector<1x8xf32> to vector<1x1x8xf32>
    tpu.vector_store %arg4[%c0_51, %c0_52, %c0_53], %53 {strides = array<i32>} : memref<1x2x8xf32, #tpu.memory_space<vmem>>, vector<1x1x8xf32>,
    %54 = arith.mulf %44, %44 : vector<64x8xf32>
    %cst_54 = arith.constant dense<0.000000e+00> : vector<8xf32>
    %55 = vector.multi_reduction <add>, %54, %cst_54 [0] : vector<64x8xf32> to vector<8xf32>
    %56 = vector.shape_cast %55 : vector<8xf32> to vector<1x8xf32>
    %c0_55 = arith.constant 0 : index
    %c1_56 = arith.constant 1 : index
    %c0_57 = arith.constant 0 : index
    %57 = vector.load %arg4[%c0_55, %c1_56, %c0_57] : memref<1x2x8xf32, #tpu.memory_space<vmem>>, vector<1x1x8xf32>
    %58 = vector.shape_cast %57 : vector<1x1x8xf32> to vector<1x8xf32>
    %59 = vector.shape_cast %56 : vector<1x8xf32> to vector<1x1x8xf32>
    tpu.vector_store %arg4[%c0_55, %c1_56, %c0_57], %59 {strides = array<i32>} : memref<1x2x8xf32, #tpu.memory_space<vmem>>, vector<1x1x8xf32>,
    return
  }
  func.func @transform_0(%arg0: i32) -> (i32, i32, i32, i32, i32, i32) {
    %c0_i32 = arith.constant 0 : i32
    %c0_i32_0 = arith.constant 0 : i32
    %c0_i32_1 = arith.constant 0 : i32
    %c0_i32_2 = arith.constant 0 : i32
    %c0_i32_3 = arith.constant 0 : i32
    %c0_i32_4 = arith.constant 0 : i32
    return %arg0, %c0_i32, %c0_i32_0, %c0_i32_1, %c0_i32_2, %c0_i32_3 : i32, i32, i32, i32, i32, i32
  }
  func.func @transform_1(%arg0: i32) -> (i32, i32) {
    %c0_i32 = arith.constant 0 : i32
    %c0_i32_0 = arith.constant 0 : i32
    %c0_i32_1 = arith.constant 0 : i32
    return %c0_i32, %c0_i32_0 : i32, i32
  }
  func.func @transform_2(%arg0: i32) -> (i32, i32, i32, i32) {
    %c0_i32 = arith.constant 0 : i32
    %c0_i32_0 = arith.constant 0 : i32
    %c0_i32_1 = arith.constant 0 : i32
    %c0_i32_2 = arith.constant 0 : i32
    return %arg0, %c0_i32, %c0_i32_0, %c0_i32_1 : i32, i32, i32, i32
  }
  func.func @transform_3(%arg0: i32) -> (i32, i32, i32) {
    %c0_i32 = arith.constant 0 : i32
    %c0_i32_0 = arith.constant 0 : i32
    %c0_i32_1 = arith.constant 0 : i32
    return %arg0, %c0_i32, %c0_i32_0 : i32, i32, i32
  }
}

</mosaic_0001>

<bundles_post_ra>
// kernel: tpu_custom_call.1
= control target key start
LH: loop header
LB: loop body
LE: loop exit
PB: predicated region body
PF: predicated region fallthrough
CT: control target
= control target key end

     0   :  { %9 = vsyncpa [#allocation5], 0  ;;  %s1702_s0 = inlined_call_operand.vmem [shape: f32[2,2,2,8,8,4], index: 0, kind: input, shape index: {}]   ;;  %s1703_s1 = inlined_call_operand.vmem [shape: f32[36,8], index: 1, kind: input, shape index: {}]   ;;  %s1704_s2 = inlined_call_operand.hbm [shape: f32[2,8,8,8], index: 2, kind: output, shape index: {0}]   ;;  %s1705_s3 = inlined_call_operand.hbm [shape: f32[2,2,8], index: 3, kind: output, shape index: {1}]  }
   0x1   :  { %11 = vsyncpa [#allocation5 + $0x1], 0 }
   0x2   :  { %12 = vsyncpa [#allocation7], 0 }
   0x3   :  { %14 = vsyncpa [#allocation7 + $0x1], 0  ;;  %s1260_s12 = smov 0   ;;  %s1262_s13 = smov 0  }
   0x4   :  { %s1264_s14 = smov 0   ;;  %s1266_s15 = smov 0  }
   0x5 LB: > { %s1281_s16 = sadd.s32 4294967295, %s1226_s15   ;;  %s979_s17 = sadd.s32 4294967294, %s1226_s15   ;;  %s1226_s15 = sphi %s1266_s15, %s1711_s15   ;;  %s1222_s14 = sphi %s1264_s14, %s1710_s14   ;;  %s1218_s13 = sphi %s1262_s13, %s1709_s13   ;;  %s1214_s12 = sphi %s1260_s12, %s1708_s12  }
   0x6   : > { %s1285_s18 = sadd.s32 1, %s1226_s15   ;;  %s74_s19 = sadd.s32 1, %s1222_s14 }
   0x7   : > { %s71_s20 = ssub.s32 %s1226_s15, %s1285_s18  ;;  %p84_p0 = scmp.ne.s32.totalorder %s1222_s14, %s1218_s13 }
   0x8   : > { %p72_p1 = scmp.eq.s32.totalorder %s71_s20, 0  ;;  %p85_p2 = scmp.eq.s32.totalorder %s1281_s16, 1 }
   0x9   : > { %p90_p3 = scmp.ne.s32.totalorder %s1218_s13, %s1214_s12  ;;  %p91_p4 = scmp.eq.s32.totalorder %s979_s17, 1 }
   0xa   : > { %s1296_s21 = scalar_select %p72_p1, %s1222_s14, %s74_s19  }
   0xb   : > { %p1298_p5 = por %p85_p2, %p84_p0  ;;  %p1302_p6 = por %p91_p4, %p90_p3 }
   0xc   : > { %p982_p7 = scmp.ge.s32.totalorder %s1226_s15, 1  ;;  %p146_p8 = scmp.lt.s32.totalorder %s1226_s15, 3 }
   0xe   : > { %p147_p9 = pnand %p982_p7, %p146_p8 }
   0xf   : > { %vm239_vm0 = vcmask (!%p147_p9), 31744   ;;  %vm241_vm1 = vcmask (!%p147_p9), 25600   ;;  %v1228_v0 = vmov (!%p147_p9), 0.0   ;;  %p175_p10 = scmp.lt.s32.totalorder (!%p147_p9), %s1281_s16, 1  ;;  %vm372_vm2 = vcmask (!%p147_p9), 1045504   ;;  %s1229_s29 = smov (!%p147_p9), 8  }
  0x10   : > { %150 = sbr.rel (%p147_p9) target bundleno = 545 (0x221), region = 28  ;;  %240 = vst.msk [vmem:[#allocation2] sm:$0xff] (!%p147_p9), %vm239_vm0, %v1228_v0  ;;  %243 = vst.msk [vmem:[#allocation2 + $0x10] sm:$0xff] (!%p147_p9), %vm239_vm0, %v1228_v0  ;;  %vm314_vm3 = vcmask (!%p147_p9), 1046528   ;;  %s1230_s30 = smov (!%p147_p9), 4   ;;  %vm682_vm4 = vcmask (!%p147_p9), 1043456  }
  0x11   : > { %242 = vst.msk [vmem:[#allocation2 + $0x8] sm:$0x3] (!%p147_p9), %vm241_vm1, %v1228_v0  ;;  %244 = vst.msk [vmem:[#allocation2 + $0x18] sm:$0x3] (!%p147_p9), %vm241_vm1, %v1228_v0  ;;  %s1231_s4 = smov (!%p147_p9), 12   ;;  %s1232_s5 = smov (!%p147_p9), 16  }
  0x12   : > { %245 = vst.msk [vmem:[#allocation2 + $0x20] sm:$0xff] (!%p147_p9), %vm239_vm0, %v1228_v0  ;;  %247 = vst.msk [vmem:[#allocation2 + $0x30] sm:$0xff] (!%p147_p9), %vm239_vm0, %v1228_v0  ;;  %s1233_s6 = smov (!%p147_p9), 20   ;;  %s1234_s7 = smov (!%p147_p9), 24   ;;  %vm363_vm5 = vcmask (!%p147_p9), 64544   ;;  %vm421_vm6 = vcmask (!%p147_p9), 97344  }
  0x13   : > { %246 = vst.msk [vmem:[#allocation2 + $0x28] sm:$0x3] (!%p147_p9), %vm241_vm1, %v1228_v0  ;;  %248 = vst.msk [vmem:[#allocation2 + $0x38] sm:$0x3] (!%p147_p9), %vm241_vm1, %v1228_v0  ;;  %s1235_s17 = smov (!%p147_p9), 28   ;;  %s1236_s26 = smov (!%p147_p9), 32  }
  0x14   : > { %249 = vst.msk [vmem:[#allocation2 + $0x40] sm:$0xff] (!%p147_p9), %vm239_vm0, %v1228_v0  ;;  %251 = vst.msk [vmem:[#allocation2 + $0x50] sm:$0xff] (!%p147_p9), %vm239_vm0, %v1228_v0  ;;  %vm455_vm7 = vcmask (!%p147_p9), 130144   ;;  %vm492_vm8 = vcmask (!%p147_p9), 162944   ;;  %vm528_vm9 = vcmask (!%p147_p9), 195744   ;;  %vm562_vm10 = vcmask (!%p147_p9), 228544  }
  0x15   : > { %250 = vst.msk [vmem:[#allocation2 + $0x48] sm:$0x3] (!%p147_p9), %vm241_vm1, %v1228_v0  ;;  %252 = vst.msk [vmem:[#allocation2 + $0x58] sm:$0x3] (!%p147_p9), %vm241_vm1, %v1228_v0  ;;  %vm599_vm11 = vcmask (!%p147_p9), 261344   ;;  %vm635_vm12 = vcmask (!%p147_p9), 294144  }
  0x16   : > { %253 = vst.msk [vmem:[#allocation2 + $0x60] sm:$0xff] (!%p147_p9), %vm239_vm0, %v1228_v0  ;;  %255 = vst.msk [vmem:[#allocation2 + $0x70] sm:$0xff] (!%p147_p9), %vm239_vm0, %v1228_v0  ;;  %vm657_vm13 = vcmask (!%p147_p9), 293888   ;;  %vm791_vm14 = vcmask (!%p147_p9), 64512   ;;  %s1237_s19 = smov (!%p147_p9), [#allocation4]  }
  0x17   : > { %254 = vst.msk [vmem:[#allocation2 + $0x68] sm:$0x3] %vm241_vm1, %v1228_v0  ;;  %256 = vst.msk [vmem:[#allocation2 + $0x78] sm:$0x3] %vm241_vm1, %v1228_v0  ;;  %s176_s24 = scalar_select %p175_p10, %s1281_s16, 1  ;;  %v270_v4 = vld [vmem:[#allocation2] sm:$0xff] }
  0x18   : > { %257 = vst.msk [vmem:[#allocation2 + $0x80] sm:$0xff] %vm239_vm0, %v1228_v0  ;;  %259 = vst.msk [vmem:[#allocation2 + $0x90] sm:$0xff] %vm239_vm0, %v1228_v0  ;;  %v271_v5 = vld [vmem:[#allocation2 + $0x8] sm:$0x3]  ;;  %v373_v8 = vrot.slane %v270_v4, 2  ;;  %v315_v10 = vrot.slane %v270_v4, 1 }
  0x19   : > { %258 = vst.msk [vmem:[#allocation2 + $0x88] sm:$0x3] %vm241_vm1, %v1228_v0  ;;  %260 = vst.msk [vmem:[#allocation2 + $0x98] sm:$0x3] %vm241_vm1, %v1228_v0  ;;  %s1027_s25 = sshll.u32 %s176_s24, 8  ;;  %v374_v9 = vrot.slane %v271_v5, 2 }
  0x1a   : > { %s1333_s28 = scalar_lea.vmem %s1702_s0, %s1027_s25  ;;  %290 = vst.msk [vmem:[#allocation3] sm:$0xff] %vm239_vm0, %v270_v4  ;;  %v316_v11 = vrot.slane %v271_v5, 1  ;;  %s1136_s20 = sshll.u32 %s1237_s19, 4  ;;  %s1137_s20 = int_to_ptr.vmem [resolvable:$false] %s1136_s20 }
  0x1b   : > { %v181_v1 = vld [vmem:[%s1333_s28 + $0x8] sm:$0xff]  ;;  %v180_v12 = vld [vmem:[%s1333_s28] sm:$0xff]  ;;  %v182_v18 = vld [vmem:[%s1333_s28 + $0x10] sm:$0xff]  ;;  %v375_v19 = vsel %vm372_vm2, %v373_v8, %v374_v9  ;;  %s1138_s24 = scalar_lea.vmem %s1137_s20, 2048 }
  0x1c   : > { %v988_v2 = vld [vmem:[%s1333_s28 + $0x48] sm:$0xff]  ;;  %v987_v13 = vld [vmem:[%s1333_s28 + $0x40] sm:$0xff]  ;;  %v317_v20 = vsel %vm314_vm3, %v315_v10, %v316_v11  ;;  %v989_v22 = vld [vmem:[%s1333_s28 + $0x50] sm:$0xff]  ;;  %397 = vrot.lane.b32.xlu1 %v375_v19, %s1229_s29 }
  0x1d   : > { %v996_v3 = vld [vmem:[%s1333_s28 + $0x88] sm:$0xff]  ;;  %v198_v6 = vmax.f32 %v181_v1, %v988_v2  ;;  %v197_v15 = vmax.f32 %v180_v12, %v987_v13  ;;  %v995_v16 = vld [vmem:[%s1333_s28 + $0x80] sm:$0xff]  ;;  %v997_v23 = vld [vmem:[%s1333_s28 + $0x90] sm:$0xff]  ;;  %339 = vrot.lane.b32.xlu0 %v317_v20, %s1230_s30  ;;  %v199_v26 = vmax.f32 %v182_v18, %v989_v22 }
  0x1e   : > { %v1004_v7 = vld [vmem:[%s1333_s28 + $0xc8] sm:$0xff]  ;;  %v1003_v17 = vld [vmem:[%s1333_s28 + $0xc0] sm:$0xff]  ;;  %v1005_v24 = vld [vmem:[%s1333_s28 + $0xd0] sm:$0xff] }
  0x1f   : > { %v224_v14 = vmax.f32 %v996_v3, %v1004_v7  ;;  %v223_v21 = vmax.f32 %v995_v16, %v1003_v17  ;;  %v225_v27 = vmax.f32 %v997_v23, %v1005_v24  ;;  %v183_v28 = vld [vmem:[%s1333_s28 + $0x18] sm:$0xff]  ;;  %v184_v34 = vld [vmem:[%s1333_s28 + $0x20] sm:$0xff]  ;;  %v185_v42 = vld [vmem:[%s1333_s28 + $0x28] sm:$0xff] }
  0x20   : > { %v990_v29 = vld [vmem:[%s1333_s28 + $0x58] sm:$0xff]  ;;  %v991_v37 = vld [vmem:[%s1333_s28 + $0x60] sm:$0xff]  ;;  %v992_v43 = vld [vmem:[%s1333_s28 + $0x68] sm:$0xff] }
  0x21   : > { %v232_v25 = vmax.f32 %v198_v6, %v224_v14  ;;  %v231_v30 = vmax.f32 %v197_v15, %v223_v21  ;;  %v200_v31 = vmax.f32 %v183_v28, %v990_v29  ;;  %v998_v32 = vld [vmem:[%s1333_s28 + $0x98] sm:$0xff]  ;;  %v233_v35 = vmax.f32 %v199_v26, %v225_v27  ;;  %v999_v38 = vld [vmem:[%s1333_s28 + $0xa0] sm:$0xff]  ;;  %v1000_v44 = vld [vmem:[%s1333_s28 + $0xa8] sm:$0xff] }
  0x22   : > { %v1006_v33 = vld [vmem:[%s1333_s28 + $0xd8] sm:$0xff]  ;;  %v1007_v39 = vld [vmem:[%s1333_s28 + $0xe0] sm:$0xff]  ;;  %v201_v40 = vmax.f32 %v184_v34, %v991_v37  ;;  %v202_v46 = vmax.f32 %v185_v42, %v992_v43  ;;  %v1008_v47 = vld [vmem:[%s1333_s28 + $0xe8] sm:$0xff] }
  0x23   : > { %263 = vst.msk [vmem:[#allocation2 + $0x21] sm:$0xff] %vm239_vm0, %v232_v25  ;;  %v226_v36 = vmax.f32 %v998_v32, %v1006_v33  ;;  %262 = vst.msk [vmem:[#allocation2 + $0x11] sm:$0xff] %vm239_vm0, %v231_v30  ;;  %v227_v41 = vmax.f32 %v999_v38, %v1007_v39  ;;  %v186_v48 = vld [vmem:[%s1333_s28 + $0x30] sm:$0xff]  ;;  %v228_v51 = vmax.f32 %v1000_v44, %v1008_v47  ;;  %v187_v55 = vld [vmem:[%s1333_s28 + $0x38] sm:$0xff] }
  0x24   : > { %264 = vst.msk [vmem:[#allocation2 + $0x31] sm:$0xff] %vm239_vm0, %v233_v35  ;;  %v993_v49 = vld [vmem:[%s1333_s28 + $0x70] sm:$0xff]  ;;  %v994_v57 = vld [vmem:[%s1333_s28 + $0x78] sm:$0xff]  ;;  %v652_v29 = vld [vmem:[%s1703_s1] sm:$0xff] }
  0x25   : > { %v234_v45 = vmax.f32 %v200_v31, %v226_v36  ;;  %v235_v50 = vmax.f32 %v201_v40, %v227_v41  ;;  %v203_v52 = vmax.f32 %v186_v48, %v993_v49  ;;  %v1001_v53 = vld [vmem:[%s1333_s28 + $0xb0] sm:$0xff]  ;;  %v1002_v58 = vld [vmem:[%s1333_s28 + $0xb8] sm:$0xff]  ;;  %v236_v60 = vmax.f32 %v202_v46, %v228_v51  ;;  %v653_v30 = vld [vmem:[%s1703_s1 + $0x8] sm:$0xff] }
  0x26   : > { %v1009_v54 = vld [vmem:[%s1333_s28 + $0xf0] sm:$0xff]  ;;  %v1010_v59 = vld [vmem:[%s1333_s28 + $0xf8] sm:$0xff]  ;;  %v204_v61 = vmax.f32 %v187_v55, %v994_v57  ;;  %v1064_v31 = vpack.c.bf16 %v653_v30, %v652_v29  ;;  %v656_v38 = vld [vmem:[%s1703_s1 + $0x20] sm:$0xf] }
  0x27   : > { %265 = vst.msk [vmem:[#allocation2 + $0x41] sm:$0xff] %vm239_vm0, %v234_v45  ;;  %v229_v56 = vmax.f32 %v1001_v53, %v1009_v54  ;;  %266 = vst.msk [vmem:[#allocation2 + $0x51] sm:$0xff] %vm239_vm0, %v235_v50  ;;  %v230_v62 = vmax.f32 %v1002_v58, %v1010_v59  ;;  %v654_v33 = vld [vmem:[%s1703_s1 + $0x10] sm:$0xff]  ;;  %v655_v34 = vld [vmem:[%s1703_s1 + $0x18] sm:$0xff] }
  0x28   : > { %267 = vst.msk [vmem:[#allocation2 + $0x61] sm:$0xff] %vm239_vm0, %v236_v60  ;;  %1065 = vmatprep.subr.bf16.mxu0 %v1064_v31  ;;  %1072 = vmatprep.subr.bf16.mxu1 %v1064_v31  ;;  %v1068_v35 = vpack.c.bf16 %v655_v34, %v654_v33 }
  0x29   : > { %v237_v63 = vmax.f32 %v203_v52, %v229_v56  ;;  %v238_v2 = vmax.f32 %v204_v61, %v230_v62  ;;  %1067 = vmatpush3.bf16.msra.mxu0 %v1064_v31  ;;  %1075 = vmatpush3.bf16.msra.mxu1 %v1064_v31 }
  0x2a   : > { %v274_v0 = vld [vmem:[#allocation2 + $0x20] sm:$0xff]  ;;  %v275_v1 = vld [vmem:[#allocation2 + $0x28] sm:$0x3]  ;;  %v272_v3 = vld [vmem:[#allocation2 + $0x10] sm:$0xff]  ;;  %1069 = vmatprep.subr.bf16.mxu0 %v1068_v35  ;;  %1073 = vmatprep.subr.bf16.mxu1 %v1068_v35 }
  0x2b   : > { %433 = vrot.lane.b32.xlu1 %v274_v0, %s1231_s4  ;;  %292 = vst.msk [vmem:[#allocation3 + $0x10] sm:$0xff] %vm239_vm0, %v274_v0  ;;  %v273_v4 = vld [vmem:[#allocation2 + $0x18] sm:$0x3]  ;;  %v321_v5 = vrot.slane %v274_v0, 1  ;;  %v322_v6 = vrot.slane %v275_v1, 1  ;;  %268 = vst.msk [vmem:[#allocation2 + $0x71] sm:$0xff] %vm239_vm0, %v237_v63  ;;  %431 = vrot.lane.b32.xlu0 %v272_v3, %s1231_s4 }
  0x2c   : > { %291 = vst.msk [vmem:[#allocation3 + $0x8] sm:$0xff] %vm239_vm0, %v272_v3  ;;  %v376_v7 = vrot.slane %v272_v3, 2  ;;  %v377_v8 = vrot.slane %v273_v4, 2  ;;  %v318_v9 = vrot.slane %v272_v3, 1  ;;  %v319_v10 = vrot.slane %v273_v4, 1  ;;  %v276_v11 = vld [vmem:[#allocation2 + $0x30] sm:$0xff] }
  0x2d   : > { %269 = vst.msk [vmem:[#allocation2 + $0x81] sm:$0xff] %vm239_vm0, %v238_v2  ;;  %293 = vst.msk [vmem:[#allocation3 + $0x18] sm:$0xff] %vm239_vm0, %v276_v11  ;;  %v323_v16 = vsel %vm314_vm3, %v321_v5, %v322_v6  ;;  %v277_v18 = vld [vmem:[#allocation2 + $0x38] sm:$0x3]  ;;  %v379_v20 = vrot.slane %v274_v0, 2  ;;  %v380_v21 = vrot.slane %v275_v1, 2  ;;  %1071 = vmatpush3.bf16.msra.mxu0 %v1068_v35  ;;  %1076 = vmatpush3.bf16.msra.mxu1 %v1068_v35 }
  0x2e   : > { %v378_v12 = vsel %vm372_vm2, %v376_v7, %v377_v8  ;;  %v320_v13 = vsel %vm314_vm3, %v318_v9, %v319_v10  ;;  %v1387_v14 = vld [vmem:[#allocation2 + $0x40] sm:$0xff]  ;;  %v1392_v15 = vld [vmem:[#allocation2 + $0x50] sm:$0xff]  ;;  %v324_v22 = vrot.slane %v276_v11, 1  ;;  %v325_v23 = vrot.slane %v277_v18, 1  ;;  %v279_v32 = vld [vmem:[#allocation2 + $0x48] sm:$0x3]  ;;  %1050 = vmatprep.subr.msk.mxu0 %vm682_vm4, %v656_v38  ;;  %1074 = vmatprep.subr.msk.mxu1 %vm682_vm4, %v656_v38 }
  0x2f   : > { %399 = vrot.lane.b32.xlu1 %v378_v12, %s1229_s29  ;;  %294 = vst.msk [vmem:[#allocation3 + $0x20] sm:$0xff] %vm239_vm0, %v1387_v14  ;;  %341 = vrot.lane.b32.xlu0 %v320_v13, %s1230_s30  ;;  %295 = vst.msk [vmem:[#allocation3 + $0x28] sm:$0xff] %vm239_vm0, %v1392_v15  ;;  %v1398_v17 = vld [vmem:[#allocation2 + $0x60] sm:$0xff]  ;;  %v381_v24 = vsel %vm372_vm2, %v379_v20, %v380_v21  ;;  %v382_v26 = vrot.slane %v276_v11, 2  ;;  %v383_v27 = vrot.slane %v277_v18, 2  ;;  %v327_v36 = vrot.slane %v1387_v14, 1 }
  0x30   : > { %296 = vst.msk [vmem:[#allocation3 + $0x30] sm:$0xff] %vm239_vm0, %v1398_v17  ;;  %v326_v25 = vsel %vm314_vm3, %v324_v22, %v325_v23  ;;  %v328_v37 = vrot.slane %v279_v32, 1  ;;  %v281_v40 = vld [vmem:[#allocation2 + $0x58] sm:$0x3]  ;;  %v385_v41 = vrot.slane %v1387_v14, 2  ;;  %v386_v42 = vrot.slane %v279_v32, 2 }
  0x31   : > { %v384_v28 = vsel %vm372_vm2, %v382_v26, %v383_v27  ;;  %1051 = vmatpush3.msk.msra.mxu0 %vm682_vm4, %v656_v38  ;;  %1077 = vmatpush3.msk.msra.mxu1 %vm682_vm4, %v656_v38  ;;  %v330_v43 = vrot.slane %v1392_v15, 1  ;;  %v331_v44 = vrot.slane %v281_v40, 1  ;;  %v388_v47 = vrot.slane %v1392_v15, 2  ;;  %v283_v50 = vld [vmem:[#allocation2 + $0x68] sm:$0x3]  ;;  %v288_v10 = vld [vmem:[#allocation2 + $0x90] sm:$0xff] }
  0x32   : > { %v1402_v19 = vld [vmem:[#allocation2 + $0x70] sm:$0xff]  ;;  %v329_v39 = vsel %vm314_vm3, %v327_v36, %v328_v37  ;;  %v387_v45 = vsel %vm372_vm2, %v385_v41, %v386_v42  ;;  %v389_v48 = vrot.slane %v281_v40, 2  ;;  %v333_v51 = vrot.slane %v1398_v17, 1  ;;  %v285_v54 = vld [vmem:[#allocation2 + $0x78] sm:$0x3] }
  0x33   : > { %343 = vrot.lane.b32.xlu1 %v323_v16, %s1230_s30  ;;  %297 = vst.msk [vmem:[#allocation3 + $0x38] sm:$0xff] %vm239_vm0, %v1402_v19  ;;  %468 = vrot.lane.b32.xlu0 %v320_v13, %s1232_s5  ;;  %v332_v46 = vsel %vm314_vm3, %v330_v43, %v331_v44  ;;  %v334_v52 = vrot.slane %v283_v50, 1  ;;  %v391_v55 = vrot.slane %v1398_v17, 2  ;;  %v392_v56 = vrot.slane %v283_v50, 2 }
  0x34   : > { %v390_v49 = vsel %vm372_vm2, %v388_v47, %v389_v48  ;;  %v336_v57 = vrot.slane %v1402_v19, 1  ;;  %v337_v58 = vrot.slane %v285_v54, 1  ;;  %v394_v61 = vrot.slane %v1402_v19, 2  ;;  %v287_v1 = vld [vmem:[#allocation2 + $0x88] sm:$0x3] }
  0x35   : > { %v335_v53 = vsel %vm314_vm3, %v333_v51, %v334_v52  ;;  %v393_v59 = vsel %vm372_vm2, %v391_v55, %v392_v56  ;;  %v395_v62 = vrot.slane %v285_v54, 2  ;;  %v466_v3 = vrot.slane %v287_v1, 1 }
  0x36   : > { %v338_v60 = vsel %vm314_vm3, %v336_v57, %v337_v58  ;;  %v502_v5 = vrot.slane %v287_v1, 2 }
  0x37   : > { %504 = vrot.lane.b32.xlu1 %v378_v12, %s1233_s6  ;;  %470 = vrot.lane.b32.xlu0 %v323_v16, %s1232_s5  ;;  %v396_v63 = vsel %vm372_vm2, %v394_v61, %v395_v62  ;;  %v572_v12 = vrot.slane %v288_v10, 1 }
  0x3b   : > { %401 = vrot.lane.b32.xlu1 %v381_v24, %s1229_s29  ;;  %345 = vrot.lane.b32.xlu0 %v326_v25, %s1230_s30 }
  0x3f   : > { %538 = vrot.lane.b32.xlu1 %v274_v0, %s1234_s7  ;;  %506 = vrot.lane.b32.xlu0 %v381_v24, %s1233_s6  ;;  %v286_v0 = vld [vmem:[#allocation2 + $0x80] sm:$0xff] }
  0x40   : > { %v465_v2 = vrot.slane %v286_v0, 1  ;;  %v501_v4 = vrot.slane %v286_v0, 2 }
  0x42   : > { %v467_v6 = vsel %vm314_vm3, %v465_v2, %v466_v3  ;;  %v503_v9 = vsel %vm372_vm2, %v501_v4, %v502_v5 }
  0x43   : > { %435 = vrot.lane.b32.xlu1 %v276_v11, %s1231_s4  ;;  %403 = vrot.lane.b32.xlu0 %v384_v28, %s1229_s29 }
  0x47   : > { %575 = vrot.lane.b32.xlu1 %v323_v16, %s1235_s17  ;;  %540 = vrot.lane.b32.xlu0 %v276_v11, %s1234_s7  ;;  %v289_v11 = vld [vmem:[#allocation2 + $0x98] sm:$0x3] }
  0x48   : > { %v573_v13 = vrot.slane %v289_v11, 1  ;;  %v609_v16 = vrot.slane %v289_v11, 2 }
  0x4b   : > { %472 = vrot.lane.b32.xlu1 %v326_v25, %s1232_s5  ;;  %437 = vrot.lane.b32.xlu0 %v1387_v14, %s1231_s4 }
  0x4f   : > { %611 = vrot.lane.b32.xlu1 %v381_v24, %s1236_s26  ;;  %577 = vrot.lane.b32.xlu0 %v326_v25, %s1235_s17 }
  0x53   : > { %474 = vrot.lane.b32.xlu1 %v329_v39, %s1232_s5  ;;  %347 = vrot.lane.b32.xlu0 %v329_v39, %s1230_s30 }
  0x57   : > { %613 = vrot.lane.b32.xlu1 %v384_v28, %s1236_s26  ;;  %508 = vrot.lane.b32.xlu0 %v384_v28, %s1233_s6 }
  0x5b   : > { %405 = vrot.lane.b32.xlu1 %v387_v45, %s1229_s29  ;;  %349 = vrot.lane.b32.xlu0 %v332_v46, %s1230_s30 }
  0x5f   : > { %542 = vrot.lane.b32.xlu1 %v1387_v14, %s1234_s7  ;;  %510 = vrot.lane.b32.xlu0 %v387_v45, %s1233_s6  ;;  %v608_v14 = vrot.slane %v288_v10, 2 }
  0x63   : > { %439 = vrot.lane.b32.xlu1 %v1392_v15, %s1231_s4  ;;  %407 = vrot.lane.b32.xlu0 %v390_v49, %s1229_s29 }
  0x67   : > { %579 = vrot.lane.b32.xlu1 %v329_v39, %s1235_s17  ;;  %544 = vrot.lane.b32.xlu0 %v1392_v15, %s1234_s7  ;;  %v574_v15 = vsel %vm314_vm3, %v572_v12, %v573_v13 }
  0x6b   : > { %476 = vrot.lane.b32.xlu1 %v332_v46, %s1232_s5  ;;  %441 = vrot.lane.b32.xlu0 %v1398_v17, %s1231_s4 }
  0x6f   : > { %615 = vrot.lane.b32.xlu1 %v387_v45, %s1236_s26  ;;  %581 = vrot.lane.b32.xlu0 %v332_v46, %s1235_s17 }
  0x73   : > { %478 = vrot.lane.b32.xlu1 %v335_v53, %s1232_s5  ;;  %351 = vrot.lane.b32.xlu0 %v335_v53, %s1230_s30 }
  0x77   : > { %617 = vrot.lane.b32.xlu1 %v390_v49, %s1236_s26  ;;  %512 = vrot.lane.b32.xlu0 %v390_v49, %s1233_s6 }
  0x7b   : > { %409 = vrot.lane.b32.xlu1 %v393_v59, %s1229_s29  ;;  %353 = vrot.lane.b32.xlu0 %v338_v60, %s1230_s30  ;;  %s1583_s30 = sand.u32 1, %s1218_s13  }
  0x7c   : > { %s854_s11 = scalar_lea.sflag [#allocation5], %s1583_s30 }
  0x7f   : > { %546 = vrot.lane.b32.xlu1 %v1398_v17, %s1234_s7  ;;  %514 = vrot.lane.b32.xlu0 %v393_v59, %s1233_s6 }
  0x83   : > { %443 = vrot.lane.b32.xlu1 %v1402_v19, %s1231_s4  ;;  %411 = vrot.lane.b32.xlu0 %v396_v63, %s1229_s29 }
  0x87   : > { %583 = vrot.lane.b32.xlu1 %v335_v53, %s1235_s17  ;;  %548 = vrot.lane.b32.xlu0 %v1402_v19, %s1234_s7  ;;  %v610_v19 = vsel %vm372_vm2, %v608_v14, %v609_v16 }
  0x8b   : > { %480 = vrot.lane.b32.xlu1 %v338_v60, %s1232_s5  ;;  %445 = vrot.lane.b32.xlu0 %v286_v0, %s1231_s4  ;;  %s983_s4 = sshll.u32 %s1583_s30, 6 }
  0x8e   : > { %v398_v7 = vpop.permute.xlu1 %397 }
  0x8f   : > { %619 = vrot.lane.b32.xlu1 %v393_v59, %s1236_s26  ;;  %585 = vrot.lane.b32.xlu0 %v338_v60, %s1235_s17  ;;  %v340_v8 = vpop.permute.xlu0 %339 }
  0x90   : > { %364 = vst.msk [vmem:[#allocation3] sm:$0xff] %vm363_vm5, %v340_v8 }
  0x91   : > { %422 = vst.msk [vmem:[#allocation3] sm:$0xff] %vm421_vm6, %v398_v7 }
  0x93   : > { %516 = vrot.lane.b32.xlu1 %v396_v63, %s1233_s6  ;;  %482 = vrot.lane.b32.xlu0 %v467_v6, %s1232_s5  ;;  %s1586_s5 = scalar_lea.vmem [#allocation4], %s983_s4 }
  0x97   : > { %518 = vrot.lane.b32.xlu1 %v503_v9, %s1233_s6  ;;  %621 = vrot.lane.b32.xlu0 %v396_v63, %s1236_s26  ;;  %s1028_s6 = sshll.u32 %s1281_s16, 10 }
  0x98   : > { %s1617_s10 = scalar_lea.hbm %s1704_s2, %s1028_s6 }
  0x9b   : > { %552 = vrot.lane.b32.xlu1 %v288_v10, %s1234_s7  ;;  %550 = vrot.lane.b32.xlu0 %v286_v0, %s1234_s7  ;;  %s872_s7 = sshll.u32 %s1586_s5, 4  ;;  %s1619_s7 = int_to_ptr.vmem [resolvable:$true] %s872_s7 }
  0x9c   : > { %p1139_p0 = scmp.lt.s32.totalorder %s1619_s7, %s1137_s20 }
  0x9d   : > { %v434_v17 = vpop.permute.xlu1 %433  ;;  %v432_v18 = vpop.permute.xlu0 %431 }
  0x9e   : > { %456 = vst.msk [vmem:[#allocation3] sm:$0xff] %vm455_vm7, %v432_v18 }
  0x9f   : > { %589 = vrot.lane.b32.xlu1 %v574_v15, %s1235_s17  ;;  %587 = vrot.lane.b32.xlu0 %v467_v6, %s1235_s17  ;;  %s1132_s17 = scalar_lea.vmem %s1619_s7, 1024 }
  0xa0   : > { %p1133_p11 = scmp.ne.s32.totalorder %s1619_s7, %s1132_s17  ;;  %p1140_p1 = scmp.lt.s32.totalorder %s1138_s24, %s1132_s17 }
  0xa1   : > { %v400_v20 = vpop.permute.xlu1 %399  ;;  %v342_v21 = vpop.permute.xlu0 %341 }
  0xa2   : > { %365 = vst.msk [vmem:[#allocation3 + $0x8] sm:$0xff] %vm363_vm5, %v342_v21  ;;  %p1134_p12 = pnand %p1133_p11, %p1298_p5  ;;  %p1141_p2 = por %p1140_p1, %p1139_p0 }
  0xa3   : > { %625 = vrot.lane.b32.xlu1 %v610_v19, %s1236_s26  ;;  %423 = vst.msk [vmem:[#allocation3 + $0x8] sm:$0xff] %vm421_vm6, %v400_v20  ;;  %623 = vrot.lane.b32.xlu0 %v503_v9, %s1236_s26 }
  0xa4   : > { %457 = vst.msk [vmem:[#allocation3 + $0x8] sm:$0xff] %vm455_vm7, %v434_v17  ;;  %p1135_p13 = pneg %p1134_p12 }
  0xa5   : > { %v344_v22 = vpop.permute.xlu1 %343  ;;  %v469_v23 = vpop.permute.xlu0 %468 }
  0xa6   : > { %366 = vst.msk [vmem:[#allocation3 + $0x10] sm:$0xff] %vm363_vm5, %v344_v22  ;;  %p1142_p3 = pnand %p1141_p2, %p1135_p13 }
  0xa7   : > { %493 = vst.msk [vmem:[#allocation3] sm:$0xff] %vm492_vm8, %v469_v23 }
  0xa9   : > { %v505_v24 = vpop.permute.xlu1 %504  ;;  %v471_v25 = vpop.permute.xlu0 %470 }
  0xaa   : > { %529 = vst.msk [vmem:[#allocation3] sm:$0xff] %vm528_vm9, %v505_v24 }
  0xab   : > { %494 = vst.msk [vmem:[#allocation3 + $0x8] sm:$0xff] %vm492_vm8, %v471_v25 }
  0xad   : > { %v402_v26 = vpop.permute.xlu1 %401  ;;  %v346_v27 = vpop.permute.xlu0 %345 }
  0xae   : > { %424 = vst.msk [vmem:[#allocation3 + $0x10] sm:$0xff] %vm421_vm6, %v402_v26 }
  0xaf   : > { %367 = vst.msk [vmem:[#allocation3 + $0x18] sm:$0xff] %vm363_vm5, %v346_v27 }
  0xb1   : > { %v539_v28 = vpop.permute.xlu1 %538  ;;  %v507_v29 = vpop.permute.xlu0 %506 }
  0xb2   : > { %563 = vst.msk [vmem:[#allocation3] sm:$0xff] %vm562_vm10, %v539_v28 }
  0xb3   : > { %530 = vst.msk [vmem:[#allocation3 + $0x8] sm:$0xff] %vm528_vm9, %v507_v29 }
  0xb5   : > { %v436_v30 = vpop.permute.xlu1 %435  ;;  %v404_v31 = vpop.permute.xlu0 %403 }
  0xb6   : > { %458 = vst.msk [vmem:[#allocation3 + $0x10] sm:$0xff] %vm455_vm7, %v436_v30 }
  0xb7   : > { %425 = vst.msk [vmem:[#allocation3 + $0x18] sm:$0xff] %vm421_vm6, %v404_v31 }
  0xb9   : > { %v576_v32 = vpop.permute.xlu1 %575  ;;  %v541_v33 = vpop.permute.xlu0 %540 }
  0xba   : > { %600 = vst.msk [vmem:[#allocation3] sm:$0xff] %vm599_vm11, %v576_v32 }
  0xbb   : > { %564 = vst.msk [vmem:[#allocation3 + $0x8] sm:$0xff] %vm562_vm10, %v541_v33 }
  0xbd   : > { %v473_v34 = vpop.permute.xlu1 %472  ;;  %v438_v35 = vpop.permute.xlu0 %437 }
  0xbe   : > { %495 = vst.msk [vmem:[#allocation3 + $0x10] sm:$0xff] %vm492_vm8, %v473_v34 }
  0xbf   : > { %459 = vst.msk [vmem:[#allocation3 + $0x18] sm:$0xff] %vm455_vm7, %v438_v35 }
  0xc1   : > { %v612_v36 = vpop.permute.xlu1 %611  ;;  %v578_v37 = vpop.permute.xlu0 %577 }
  0xc2   : > { %636 = vst.msk [vmem:[#allocation3] sm:$0xff] %vm635_vm12, %v612_v36 }
  0xc3   : > { %601 = vst.msk [vmem:[#allocation3 + $0x8] sm:$0xff] %vm599_vm11, %v578_v37 }
  0xc5   : > { %v475_v38 = vpop.permute.xlu1 %474  ;;  %v348_v39 = vpop.permute.xlu0 %347 }
  0xc6   : > { %496 = vst.msk [vmem:[#allocation3 + $0x18] sm:$0xff] %vm492_vm8, %v475_v38 }
  0xc7   : > { %368 = vst.msk [vmem:[#allocation3 + $0x20] sm:$0xff] %vm363_vm5, %v348_v39 }
  0xc9   : > { %v614_v40 = vpop.permute.xlu1 %613  ;;  %v644_v41 = vld [vmem:[#allocation3] sm:$0xff]  ;;  %v509_v42 = vpop.permute.xlu0 %508 }
  0xca   : > { %637 = vst.msk [vmem:[#allocation3 + $0x8] sm:$0xff] %vm635_vm12, %v614_v40  ;;  %1052 = vmatprep.mubr.msk.f32.mxu0 %vm657_vm13, %v644_v41 }
  0xcb   : > { %531 = vst.msk [vmem:[#allocation3 + $0x10] sm:$0xff] %vm528_vm9, %v509_v42 }
  0xcd   : > { %v406_v43 = vpop.permute.xlu1 %405  ;;  %v350_v44 = vpop.permute.xlu0 %349 }
  0xce   : > { %426 = vst.msk [vmem:[#allocation3 + $0x20] sm:$0xff] %vm421_vm6, %v406_v43 }
  0xcf   : > { %369 = vst.msk [vmem:[#allocation3 + $0x28] sm:$0xff] %vm363_vm5, %v350_v44 }
  0xd1   : > { %v543_v45 = vpop.permute.xlu1 %542  ;;  %v645_v46 = vld [vmem:[#allocation3 + $0x8] sm:$0xff]  ;;  %v511_v47 = vpop.permute.xlu0 %510 }
  0xd2   : > { %565 = vst.msk [vmem:[#allocation3 + $0x10] sm:$0xff] %vm562_vm10, %v543_v45  ;;  %1053 = vmatmul.mubr.msk.f32.vlgmr.msra.gmra.mrb[0].mxu0 %vm657_vm13, %v645_v46 }
  0xd3   : > { %532 = vst.msk [vmem:[#allocation3 + $0x18] sm:$0xff] %vm528_vm9, %v511_v47 }
  0xd5   : > { %v440_v48 = vpop.permute.xlu1 %439  ;;  %v408_v49 = vpop.permute.xlu0 %407 }
  0xd6   : > { %460 = vst.msk [vmem:[#allocation3 + $0x20] sm:$0xff] %vm455_vm7, %v440_v48 }
  0xd7   : > { %427 = vst.msk [vmem:[#allocation3 + $0x28] sm:$0xff] %vm421_vm6, %v408_v49 }
  0xd9   : > { %v580_v50 = vpop.permute.xlu1 %579  ;;  %v545_v51 = vpop.permute.xlu0 %544 }
  0xda   : > { %602 = vst.msk [vmem:[#allocation3 + $0x10] sm:$0xff] %vm599_vm11, %v580_v50 }
  0xdb   : > { %566 = vst.msk [vmem:[#allocation3 + $0x18] sm:$0xff] %vm562_vm10, %v545_v51 }
  0xdd   : > { %v477_v52 = vpop.permute.xlu1 %476  ;;  %v442_v53 = vpop.permute.xlu0 %441 }
  0xde   : > { %497 = vst.msk [vmem:[#allocation3 + $0x20] sm:$0xff] %vm492_vm8, %v477_v52 }
  0xdf   : > { %461 = vst.msk [vmem:[#allocation3 + $0x28] sm:$0xff] %vm455_vm7, %v442_v53 }
  0xe1   : > { %v616_v54 = vpop.permute.xlu1 %615  ;;  %v582_v55 = vpop.permute.xlu0 %581 }
  0xe2   : > { %638 = vst.msk [vmem:[#allocation3 + $0x10] sm:$0xff] %vm635_vm12, %v616_v54 }
  0xe3   : > { %603 = vst.msk [vmem:[#allocation3 + $0x18] sm:$0xff] %vm599_vm11, %v582_v55 }
  0xe5   : > { %v479_v56 = vpop.permute.xlu1 %478  ;;  %v352_v57 = vpop.permute.xlu0 %351 }
  0xe6   : > { %498 = vst.msk [vmem:[#allocation3 + $0x28] sm:$0xff] %vm492_vm8, %v479_v56 }
  0xe7   : > { %370 = vst.msk [vmem:[#allocation3 + $0x30] sm:$0xff] %vm363_vm5, %v352_v57 }
  0xe9   : > { %v618_v58 = vpop.permute.xlu1 %617  ;;  %v646_v59 = vld [vmem:[#allocation3 + $0x10] sm:$0xff]  ;;  %v513_v60 = vpop.permute.xlu0 %512 }
  0xea   : > { %639 = vst.msk [vmem:[#allocation3 + $0x18] sm:$0xff] %vm635_vm12, %v618_v58  ;;  %1055 = vmatprep.mubr.msk.f32.mxu0 %vm657_vm13, %v646_v59 }
  0xeb   : > { %533 = vst.msk [vmem:[#allocation3 + $0x20] sm:$0xff] %vm528_vm9, %v513_v60 }
  0xed   : > { %v410_v61 = vpop.permute.xlu1 %409  ;;  %v354_v62 = vpop.permute.xlu0 %353 }
  0xee   : > { %428 = vst.msk [vmem:[#allocation3 + $0x30] sm:$0xff] %vm421_vm6, %v410_v61 }
  0xef   : > { %371 = vst.msk [vmem:[#allocation3 + $0x38] sm:$0xff] %vm363_vm5, %v354_v62 }
  0xf1   : > { %v547_v63 = vpop.permute.xlu1 %546  ;;  %v647_v0 = vld [vmem:[#allocation3 + $0x18] sm:$0xff]  ;;  %v515_v1 = vpop.permute.xlu0 %514 }
  0xf2   : > { %567 = vst.msk [vmem:[#allocation3 + $0x20] sm:$0xff] %vm562_vm10, %v547_v63  ;;  %1056 = vmatmul.mubr.msk.f32.gmra.mrb[2].mxu0 %vm657_vm13, %v647_v0 }
  0xf3   : > { %534 = vst.msk [vmem:[#allocation3 + $0x28] sm:$0xff] %vm528_vm9, %v515_v1 }
  0xf5   : > { %v444_v2 = vpop.permute.xlu1 %443  ;;  %v412_v3 = vpop.permute.xlu0 %411 }
  0xf6   : > { %462 = vst.msk [vmem:[#allocation3 + $0x30] sm:$0xff] %vm455_vm7, %v444_v2 }
  0xf7   : > { %429 = vst.msk [vmem:[#allocation3 + $0x38] sm:$0xff] %vm421_vm6, %v412_v3 }
  0xf9   : > { %v584_v4 = vpop.permute.xlu1 %583  ;;  %v549_v5 = vpop.permute.xlu0 %548 }
  0xfa   : > { %604 = vst.msk [vmem:[#allocation3 + $0x20] sm:$0xff] %vm599_vm11, %v584_v4 }
  0xfb   : > { %568 = vst.msk [vmem:[#allocation3 + $0x28] sm:$0xff] %vm562_vm10, %v549_v5 }
  0xfd   : > { %v481_v6 = vpop.permute.xlu1 %480  ;;  %v446_v7 = vpop.permute.xlu0 %445 }
  0xfe   : > { %499 = vst.msk [vmem:[#allocation3 + $0x30] sm:$0xff] %vm492_vm8, %v481_v6 }
  0xff   : > { %463 = vst.msk [vmem:[#allocation3 + $0x38] sm:$0xff] %vm455_vm7, %v446_v7 }
 0x101   : > { %v620_v8 = vpop.permute.xlu1 %619  ;;  %v586_v9 = vpop.permute.xlu0 %585 }
 0x102   : > { %640 = vst.msk [vmem:[#allocation3 + $0x20] sm:$0xff] %vm635_vm12, %v620_v8 }
 0x103   : > { %605 = vst.msk [vmem:[#allocation3 + $0x28] sm:$0xff] %vm599_vm11, %v586_v9 }
 0x105   : > { %v517_v10 = vpop.permute.xlu1 %516  ;;  %v483_v11 = vpop.permute.xlu0 %482 }
 0x106   : > { %535 = vst.msk [vmem:[#allocation3 + $0x30] sm:$0xff] %vm528_vm9, %v517_v10 }
 0x107   : > { %500 = vst.msk [vmem:[#allocation3 + $0x38] sm:$0xff] %vm492_vm8, %v483_v11 }
 0x109   : > { %v519_v12 = vpop.permute.xlu1 %518  ;;  %v648_v13 = vld [vmem:[#allocation3 + $0x20] sm:$0xff]  ;;  %v622_v14 = vpop.permute.xlu0 %621 }
 0x10a   : > { %536 = vst.msk [vmem:[#allocation3 + $0x38] sm:$0xff] %vm528_vm9, %v519_v12  ;;  %1058 = vmatprep.mubr.msk.f32.mxu1 %vm657_vm13, %v648_v13 }
 0x10b   : > { %641 = vst.msk [vmem:[#allocation3 + $0x28] sm:$0xff] %vm635_vm12, %v622_v14 }
 0x10d   : > { %v553_v15 = vpop.permute.xlu1 %552  ;;  %v551_v16 = vpop.permute.xlu0 %550 }
 0x10e   : > { %570 = vst.msk [vmem:[#allocation3 + $0x38] sm:$0xff] %vm562_vm10, %v553_v15  ;;  %569 = vst.msk [vmem:[#allocation3 + $0x30] sm:$0xff] %vm562_vm10, %v551_v16 }
 0x111   : > { %v590_v17 = vpop.permute.xlu1 %589  ;;  %v588_v18 = vpop.permute.xlu0 %587 }
 0x112   : > { %607 = vst.msk [vmem:[#allocation3 + $0x38] sm:$0xff] %vm599_vm11, %v590_v17  ;;  %v649_v19 = vld [vmem:[#allocation3 + $0x28] sm:$0xff]  ;;  %606 = vst.msk [vmem:[#allocation3 + $0x30] sm:$0xff] %vm599_vm11, %v588_v18 }
 0x113   : > { %1059 = vmatmul.mubr.msk.f32.vlgmr.msra.gmra.mrb[0].mxu1 %vm657_vm13, %v649_v19 }
 0x115   : > { %v626_v20 = vpop.permute.xlu1 %625  ;;  %v624_v21 = vpop.permute.xlu0 %623 }
 0x116   : > { %643 = vst.msk [vmem:[#allocation3 + $0x38] sm:$0xff] %vm635_vm12, %v626_v20  ;;  %642 = vst.msk [vmem:[#allocation3 + $0x30] sm:$0xff] %vm635_vm12, %v624_v21 }
 0x11d   : > { %v651_v22 = vld [vmem:[#allocation3 + $0x38] sm:$0xff]  ;;  %v650_v23 = vld [vmem:[#allocation3 + $0x30] sm:$0xff] }
 0x11e   : > { %1061 = vmatprep.mubr.msk.f32.mxu1 %vm657_vm13, %v650_v23 }
 0x11f   : > { %1062 = vmatmul.mubr.msk.f32.gmra.mrb[2].mxu1 %vm657_vm13, %v651_v22 }
 0x1a5   : > { %v1054_v24 = vpop.f32.mrb[0].mxu0 }
 0x1a6   : > { %793 = vst.msk [vmem:[%s1586_s5 + $0x8] sm:$0xff] %vm791_vm14, %v1054_v24  ;;  %v801_v25 = vsel %vm791_vm14, %v1054_v24, 0.0  ;;  %v824_v26 = vmul.f32 %v1054_v24, %v1054_v24  ;;  %v752_v27 = vpop.f32.mrb[1].mxu0 }
 0x1a7   : > { %792 = vst.msk [vmem:[%s1586_s5] sm:$0xff] %vm791_vm14, %v752_v27  ;;  %v800_v28 = vsel %vm791_vm14, %v752_v27, 0.0  ;;  %v823_v29 = vmul.f32 %v752_v27, %v752_v27 }
 0x1a8   : > { %v832_v30 = vsel %vm791_vm14, %v824_v26, 0.0  ;;  %v802_v31 = vadd.f32 %v801_v25, %v800_v28 }
 0x1a9   : > { %v831_v32 = vsel %vm791_vm14, %v823_v29, 0.0 }
 0x1aa   : > { %v833_v33 = vadd.f32 %v832_v30, %v831_v32 }
 0x1c5   : > { %v1057_v34 = vpop.f32.mrb[2].mxu0 }
 0x1c6   : > { %795 = vst.msk [vmem:[%s1586_s5 + $0x18] sm:$0xff] %vm791_vm14, %v1057_v34  ;;  %v762_v35 = vpop.f32.mrb[3].mxu0  ;;  %v826_v36 = vmul.f32 %v1057_v34, %v1057_v34  ;;  %v805_v40 = vsel %vm791_vm14, %v1057_v34, 0.0 }
 0x1c7   : > { %794 = vst.msk [vmem:[%s1586_s5 + $0x10] sm:$0xff] %vm791_vm14, %v762_v35  ;;  %v803_v37 = vsel %vm791_vm14, %v762_v35, 0.0  ;;  %v825_v38 = vmul.f32 %v762_v35, %v762_v35 }
 0x1c8   : > { %v804_v39 = vadd.f32 %v803_v37, %v802_v31  ;;  %v836_v44 = vsel %vm791_vm14, %v826_v36, 0.0 }
 0x1c9   : > { %v834_v41 = vsel %vm791_vm14, %v825_v38, 0.0 }
 0x1ca   : > { %v806_v42 = vadd.f32 %v805_v40, %v804_v39  ;;  %v835_v43 = vadd.f32 %v834_v41, %v833_v33 }
 0x1cc   : > { %v837_v45 = vadd.f32 %v836_v44, %v835_v43 }
 0x1e6   : > { %v1060_v46 = vpop.f32.mrb[0].mxu1 }
 0x1e7   : > { %797 = vst.msk [vmem:[%s1586_s5 + $0x28] sm:$0xff] %vm791_vm14, %v1060_v46  ;;  %v772_v47 = vpop.f32.mrb[1].mxu1  ;;  %v828_v48 = vmul.f32 %v1060_v46, %v1060_v46  ;;  %v809_v52 = vsel %vm791_vm14, %v1060_v46, 0.0 }
 0x1e8   : > { %796 = vst.msk [vmem:[%s1586_s5 + $0x20] sm:$0xff] %vm791_vm14, %v772_v47  ;;  %v807_v49 = vsel %vm791_vm14, %v772_v47, 0.0  ;;  %v827_v50 = vmul.f32 %v772_v47, %v772_v47 }
 0x1e9   : > { %v808_v51 = vadd.f32 %v807_v49, %v806_v42  ;;  %v840_v56 = vsel %vm791_vm14, %v828_v48, 0.0 }
 0x1ea   : > { %v838_v53 = vsel %vm791_vm14, %v827_v50, 0.0 }
 0x1eb   : > { %v839_v54 = vadd.f32 %v838_v53, %v837_v45  ;;  %v810_v55 = vadd.f32 %v809_v52, %v808_v51 }
 0x1ed   : > { %v841_v57 = vadd.f32 %v840_v56, %v839_v54 }
 0x1f2   : > { %v1063_v58 = vpop.f32.mrb[2].mxu1 }
 0x1f3   : > { %799 = vst.msk [vmem:[%s1586_s5 + $0x38] sm:$0xff] %vm791_vm14, %v1063_v58  ;;  %v782_v59 = vpop.f32.mrb[3].mxu1  ;;  %v830_v60 = vmul.f32 %v1063_v58, %v1063_v58 }
 0x1f4   : > { %798 = vst.msk [vmem:[%s1586_s5 + $0x30] sm:$0xff] %vm791_vm14, %v782_v59  ;;  %v811_v61 = vsel %vm791_vm14, %v782_v59, 0.0  ;;  %v829_v62 = vmul.f32 %v782_v59, %v782_v59 }
 0x1f5   : > { %v812_v63 = vadd.f32 %v811_v61, %v810_v55 }
 0x1f6   : > { %1145 = shalt.err (!%p1142_p3)
}
 0x1f7   : > { %s1146_s25 = scalar_lea.hbm %s1617_s10, 1024  ;;  %s1150_s28 = scalar_lea.hbm %s1704_s2, 2048 }
 0x1f8   : > { %p1147_p4 = scmp.ne.s32.totalorder %s1617_s10, %s1146_s25  ;;  %p1151_p9 = scmp.lt.u32.totalorder %s1617_s10, %s1704_s2 }
 0x1f9   : > { %p1152_p10 = scmp.lt.u32.totalorder %s1150_s28, %s1146_s25  ;;  %p1154_p12 = scmp.lt.u32.totalorder %s1146_s25, %s1617_s10 }
 0x1fa   : > { %p1148_p7 = pnand %p1147_p4, %p1298_p5 }
 0x1fb   : > { %p1153_p11 = por %p1152_p10, %p1151_p9 }
 0x1fc   : > { %p1149_p8 = pneg %p1148_p7 }
 0x1fd   : > { %p1155_p13 = por %p1154_p12, %p1153_p11 }
 0x1ff   : > { %p1156_p0 = pnand %p1155_p13, %p1149_p8 }
 0x201   : > { %1159 = shalt.err (!%p1156_p0)
}
 0x202   : > { %s1238_s6 = smov 128   ;;  %v813_v0 = vsel %vm791_vm14, %v1063_v58, 0.0  ;;  %v842_v1 = vsel %vm791_vm14, %v829_v62, 0.0  ;;  %v844_v4 = vsel %vm791_vm14, %v830_v60, 0.0  ;;  %s984_s8 = sshll.u32 %s1583_s30, 1  ;;  %vm821_vm15 = vcmask 57344  }
 0x203   : > { %1078 = dma.vmem_to_hbm [thread:$0]  (%p1298_p5), %s1619_s7, 1024, %s1617_s10, %s854_s11, %s1238_s6, %s1238_s6, %s1229_s29   ;;  %v814_v2 = vadd.f32 %v813_v0, %v812_v63  ;;  %v843_v3 = vadd.f32 %v842_v1, %v841_v57 }
 0x204   : > { %s1024_s29 = sshll.u32 %s1281_s16, 5  ;;  %s174_s7 = scalar_lea.vmem [#allocation6], %s984_s8 }
 0x205   : > { %v815_v5 = vrot.slane %v814_v2, 4  ;;  %v845_v6 = vadd.f32 %v844_v4, %v843_v3  ;;  %s888_s9 = sshll.u32 %s174_s7, 4  ;;  %s1659_s17 = scalar_lea.hbm %s1705_s3, %s1024_s29  ;;  %s1661_s9 = int_to_ptr.vmem [resolvable:$true] %s888_s9 }
 0x206   : > { %s859_s19 = scalar_lea.sflag [#allocation7], %s1583_s30  ;;  %s1160_s20 = scalar_lea.vmem %s1661_s9, 32 }
 0x207   : > { %v816_v7 = vadd.f32 %v815_v5, %v814_v2  ;;  %v846_v8 = vrot.slane %v845_v6, 4  ;;  %p1161_p1 = scmp.ne.s32.totalorder %s1661_s9, %s1160_s20  ;;  %s1239_s16 = smov [#allocation6]  }
 0x208   : > { %s1164_s24 = sshll.u32 %s1239_s16, 4  ;;  %s1165_s24 = int_to_ptr.vmem [resolvable:$false] %s1164_s24 }
 0x209   : > { %v817_v9 = vrot.slane %v816_v7, 2  ;;  %v847_v10 = vadd.f32 %v846_v8, %v845_v6  ;;  %p1162_p2 = pnand %p1161_p1, %p1298_p5  ;;  %s1166_s25 = scalar_lea.vmem %s1165_s24, 64 }
 0x20a   : > { %p1167_p4 = scmp.lt.s32.totalorder %s1661_s9, %s1165_s24  ;;  %p1168_p7 = scmp.lt.s32.totalorder %s1166_s25, %s1160_s20 }
 0x20b   : > { %v818_v11 = vadd.f32 %v817_v9, %v816_v7  ;;  %v848_v12 = vrot.slane %v847_v10, 2  ;;  %p1163_p3 = pneg %p1162_p2 }
 0x20c   : > { %p1169_p8 = por %p1168_p7, %p1167_p4 }
 0x20d   : > { %v819_v13 = vrot.slane %v818_v11, 1  ;;  %v849_v14 = vadd.f32 %v848_v12, %v847_v10 }
 0x20e   : > { %p1170_p9 = pnand %p1169_p8, %p1163_p3 }
 0x20f   : > { %v820_v15 = vadd.f32 %v819_v13, %v818_v11  ;;  %v850_v16 = vrot.slane %v849_v14, 1 }
 0x211   : > { %822 = vst.msk [vmem:[%s174_s7] sm:$0x1] %vm821_vm15, %v820_v15  ;;  %v851_v17 = vadd.f32 %v850_v16, %v849_v14 }
 0x213   : > { %852 = vst.msk [vmem:[%s174_s7 + $0x1] sm:$0x1] %vm821_vm15, %v851_v17 }
 0x214   : > { %1173 = shalt.err (!%p1170_p9)
}
 0x215   : > { %s1174_s30 = scalar_lea.hbm %s1659_s17, 32  ;;  %s1178_s28 = scalar_lea.hbm %s1705_s3, 64 }
 0x216   : > { %p1175_p10 = scmp.ne.s32.totalorder %s1659_s17, %s1174_s30  ;;  %p1179_p13 = scmp.lt.u32.totalorder %s1659_s17, %s1705_s3 }
 0x217   : > { %p1180_p0 = scmp.lt.u32.totalorder %s1178_s28, %s1174_s30  ;;  %p1182_p2 = scmp.lt.u32.totalorder %s1174_s30, %s1659_s17 }
 0x218   : > { %p1176_p11 = pnand %p1175_p10, %p1298_p5 }
 0x219   : > { %p1181_p1 = por %p1180_p0, %p1179_p13 }
 0x21a   : > { %p1177_p12 = pneg %p1176_p11 }
 0x21b   : > { %p1183_p3 = por %p1182_p2, %p1181_p1 }
 0x21d   : > { %p1184_p4 = pnand %p1183_p3, %p1177_p12 }
 0x21f   : > { %1187 = shalt.err (!%p1184_p4)
}
 0x220   : > { %1079 = dma.vmem_to_hbm [thread:$0]  (%p1298_p5), %s1661_s9, 32, %s1659_s17, %s859_s19  }
 0x221 PF: > { %p1089_p7 = scmp.ge.s32.totalorder %s1226_s15, 2  ;;  %s900_s6 = sand.u32 1, %s1214_s12  }
 0x222   : > { %s901_s8 = scalar_lea.sflag [#allocation5], %s900_s6 }
 0x223   : > { %p1083_p8 = pnand %p1089_p7, %p1302_p6 }
 0x225   : > { %1205 = dma.done.wait (!%p1083_p8), %s901_s8, 1024  }
 0x226   : > { %1207 = vsyncadd (!%p1083_p8), %s901_s8, 4294966272  ;;  %s910_s29 = scalar_lea.sflag [#allocation7], %s900_s6 }
 0x227   : > { %1209 = dma.done.wait (!%p1083_p8), %s910_s29, 32  }
 0x228   : > { %1211 = vsyncadd (!%p1083_p8), %s910_s29, 4294967264  ;;  %p17_p5 = scmp.ge.s32.totalorder %s1285_s18, 4   ;;  %s1708_s12 = smov %s1218_s13 }
 0x229   : > { %s1709_s13 = smov %s1222_s14  ;;  %s1710_s14 = smov %s1296_s21 }
 0x22a   : > { %s1711_s15 = smov %s1285_s18  ;;  %19 = sbr.rel (!%p17_p5) target bundleno = 5 (0x5), region = 84 }
 0x231   :  { %915 = vsyncpa [#allocation5], 1 }
 0x232   :  { %917 = vsyncpa [#allocation5 + $0x1], 1 }
 0x233   :  { %918 = vsyncpa [#allocation7], 1 }
 0x234   :  { %920 = vsyncpa [#allocation7 + $0x1], 1 }

</bundles_post_ra>
